<compile_context>
chip_gen: v6e
topology: v6e:2x2x1
jax: 0.10.0
libtpu: 0.0.40
codegen_flags: <defaults>
</compile_context>

<pallas_src>
import jax
import jax.numpy as jnp
from jax.experimental import pallas as pl
from jax.experimental.pallas import tpu as pltpu


# ----------------------------------------------------------------------------
# Hardware-aware budgets
# ----------------------------------------------------------------------------
def _vmem_capacity_bytes():
    """Best-effort VMEM capacity query; conservative (v7x, 64 MiB) fallback."""
    try:
        info = pltpu.get_tpu_info()
        for attr in ("vmem_capacity_bytes", "vmem_size_bytes", "vmem_bytes"):
            v = getattr(info, attr, None)
            if v:
                return int(v)
    except Exception:
        pass
    return 64 * 1024 * 1024


def _tile_budget():
    """(max_block_bytes, vmem_limit_bytes) per generation.

    Normalize pass holds 4 double-buffered block copies (x in + y out), so the
    block budget is sized with ample headroom under the scoped-VMEM request.
    """
    vmem = _vmem_capacity_bytes()
    if vmem >= 100 * 1024 * 1024:          # v5e / v6e: 128 MiB VMEM
        return 8 * 1024 * 1024, 96 * 1024 * 1024
    return 3 * 1024 * 1024, 48 * 1024 * 1024   # v7x: 64 MiB VMEM


def _choose_tile_hw(hw, c, max_block_bytes):
    """Lane-aligned HW tile: a multiple of 128 capped by the block budget.

    For hw < 128 use the full extent (block dim == array dim is always legal).
    The grid uses cdiv, so the tile does NOT need to divide hw; the padded
    tail is masked in the stats kernel and its writes are discarded in the
    normalize kernel.
    """
    if hw <= 128:
        return hw
    max_tile = max(128, (max_block_bytes // (4 * c)) // 128 * 128)
    return min((hw // 128) * 128, max_tile)


# ----------------------------------------------------------------------------
# Pallas passes
# ----------------------------------------------------------------------------
def _channel_partial_stats(x3, tile_hw, vmem_limit):
    """Per-(sample, channel) partial sum / sum-of-squares.

    Grid (N, HW_tiles): N is "parallel" (each n owns its own (1, C, 1)
    accumulator outputs -> megacore split on v7x); the HW axis is the
    sequential reduction ("arbitrary", innermost).  Cross-N reduction is done
    on the host (O(N*C), negligible).
    """
    N, C, HW = x3.shape
    num_tiles = pl.cdiv(HW, tile_hw)
    needs_mask = (HW % tile_hw) != 0

    def kernel(x_ref, sum_ref, sq_ref):
        t = pl.program_id(1)

        @pl.when(t == 0)
        def _init():
            sum_ref[...] = jnp.zeros_like(sum_ref)
            sq_ref[...] = jnp.zeros_like(sq_ref)

        x = x_ref[0].astype(jnp.float32)                 # (C, tile_hw)
        if needs_mask:
            lane = jax.lax.broadcasted_iota(jnp.int32, x.shape, 1)
            valid = (t * tile_hw + lane) < HW
            x = jnp.where(valid, x, 0.0)                 # mask padded tail
        sum_ref[0] += jnp.sum(x, axis=1, keepdims=True)
        sq_ref[0] += jnp.sum(x * x, axis=1, keepdims=True)

    return pl.pallas_call(
        kernel,
        grid=(N, num_tiles),
        in_specs=[pl.BlockSpec((1, C, tile_hw), lambda n, t: (n, 0, t))],
        out_specs=(pl.BlockSpec((1, C, 1), lambda n, t: (n, 0, 0)),
                   pl.BlockSpec((1, C, 1), lambda n, t: (n, 0, 0))),
        out_shape=(jax.ShapeDtypeStruct((N, C, 1), jnp.float32),
                   jax.ShapeDtypeStruct((N, C, 1), jnp.float32)),
        compiler_params=pltpu.CompilerParams(
            dimension_semantics=("parallel", "arbitrary"),
            vmem_limit_bytes=vmem_limit),
    )(x3)


def _apply_scale_shift(x3, scale, shift, tile_hw, vmem_limit, out_dtype):
    """y = x * scale[c] + shift[c]; fully parallel, lane-dense, double-buffered."""
    N, C, HW = x3.shape
    num_tiles = pl.cdiv(HW, tile_hw)

    def kernel(x_ref, scale_ref, shift_ref, y_ref):
        x = x_ref[0].astype(jnp.float32)                 # (C, tile_hw)
        y = x * scale_ref[...] + shift_ref[...]
        y_ref[0] = y.astype(y_ref.dtype)

    return pl.pallas_call(
        kernel,
        grid=(N, num_tiles),
        in_specs=[pl.BlockSpec((1, C, tile_hw), lambda n, t: (n, 0, t)),
                  pl.BlockSpec((C, 1), lambda n, t: (0, 0)),
                  pl.BlockSpec((C, 1), lambda n, t: (0, 0))],
        out_specs=pl.BlockSpec((1, C, tile_hw), lambda n, t: (n, 0, t)),
        out_shape=jax.ShapeDtypeStruct((N, C, HW), out_dtype),
        compiler_params=pltpu.CompilerParams(
            dimension_semantics=("parallel", "parallel"),
            vmem_limit_bytes=vmem_limit),
    )(x3, scale, shift)


# ----------------------------------------------------------------------------
# Forward pass
# ----------------------------------------------------------------------------
def separated_batch_norm_forward(x_nchw, time, params, *, training=True,
                                 normalize="pallas", out_dtype=None,
                                 max_block_bytes=None):
    """Forward pass of SeparatedBatchNorm1d.

    Args:
      x_nchw: (N, C, H, W) input (any float dtype; math runs in f32).
      time:   Python int timestep (clamped to [0, max_length - 1]).
      params: dict with 'weight' (C,), 'bias' (C,), 'running_mean' (T, C),
              'running_var' (T, C), 'eps', 'momentum'.
      training:  True -> batch stats + running-stat update; False -> running
                 stats of the selected timestep.
      normalize: "pallas" -> dedicated Pallas scale/shift kernel;
                 "xla"    -> leave the per-channel scale/shift to XLA so it
                             fuses into the consumer (saves a full HBM
                             read+write sweep inside a real BasicBlock).
      out_dtype: output dtype (default: x dtype); e.g. bf16 halves the write
                 bandwidth of the bandwidth-bound normalize pass.
      max_block_bytes: override the per-block byte budget (testing only).

    Returns:
      (y_nchw, running_mean, running_var) with row `time` of the (T, C)
      running buffers updated only when training.
    """
    N, C, H, W = x_nchw.shape
    max_length = params['running_mean'].shape[0]
    time = int(time)
    if time >= max_length:       # same clamp as the PyTorch module
        time = max_length - 1
    if time < 0:                 # guard silent negative indexing
        time = 0
    eps = float(params['eps'])
    momentum = float(params['momentum'])
    out_dtype = x_nchw.dtype if out_dtype is None else out_dtype

    block_budget, vmem_limit = _tile_budget()
    if max_block_bytes is not None:
        block_budget = int(max_block_bytes)

    HW = H * W
    x3 = x_nchw.reshape(N, C, HW)                 # free, contiguous view
    tile_hw = _choose_tile_hw(HW, C, block_budget)

    w = params['weight'].astype(jnp.float32)
    b = params['bias'].astype(jnp.float32)
    rm = params['running_mean'][time].astype(jnp.float32)
    rv = params['running_var'][time].astype(jnp.float32)

    if training:
        psum, psq = _channel_partial_stats(x3, tile_hw, vmem_limit)
        sums = psum.sum(axis=0)[:, 0]             # (C,) tiny cross-N reduce
        sumsqs = psq.sum(axis=0)[:, 0]
        M = N * HW
        mean = sums / M
        var_b = jnp.maximum(sumsqs / M - mean * mean, 0.0)   # biased variance
        inv_std = jax.lax.rsqrt(var_b + eps)
        scale_c = w * inv_std
        shift_c = b - mean * scale_c
        # Running stats use unbiased variance (PyTorch); guard M == 1.
        var_u = var_b * (M / (M - 1.0)) if M > 1 else var_b
        new_rm = (1.0 - momentum) * rm + momentum * mean
        new_rv = (1.0 - momentum) * rv + momentum * var_u
        running_mean = params['running_mean'].at[time].set(
            new_rm.astype(params['running_mean'].dtype))
        running_var = params['running_var'].at[time].set(
            new_rv.astype(params['running_var'].dtype))
    else:
        inv_std = jax.lax.rsqrt(rv + eps)
        scale_c = w * inv_std
        shift_c = b - rm * scale_c
        running_mean = params['running_mean']
        running_var = params['running_var']

    if normalize == "pallas":
        y3 = _apply_scale_shift(x3, scale_c.reshape(C, 1), shift_c.reshape(C, 1),
                                tile_hw, vmem_limit, out_dtype)
    else:
        # Bandwidth-bound elementwise op: let XLA fuse it into the consumer
        # (next conv / spiking membrane update) — removes a full HBM sweep.
        y3 = (x3.astype(jnp.float32) * scale_c[None, :, None]
              + shift_c[None, :, None]).astype(out_dtype)

    y_nchw = y3.reshape(N, C, H, W)
    return y_nchw, running_mean, running_var


def init_params(num_features, max_length, key, eps=1e-5, momentum=0.1):
    """Parameter init mirroring SeparatedBatchNorm1d.reset_parameters."""
    weight = jax.random.uniform(key, (num_features,), dtype=jnp.float32)  # uniform_()
    bias = jnp.zeros((num_features,), dtype=jnp.float32)
    running_mean = jnp.zeros((max_length, num_features), dtype=jnp.float32)
    running_var = jnp.ones((max_length, num_features), dtype=jnp.float32)
    return {
        'weight': weight,
        'bias': bias,
        'running_mean': running_mean,
        'running_var': running_var,
        'eps': eps,
        'momentum': momentum,
    }


# ----------------------------------------------------------------------------
# Main
# ----------------------------------------------------------------------------
if __name__ == "__main__":
    key = jax.random.PRNGKey(0)
    k_x, k_w, k_x2, k_x3 = jax.random.split(key, 4)

    def _bn_ref(x, mean, var, w, b, eps):
        return ((x - mean[None, :, None, None])
                / jnp.sqrt(var[None, :, None, None] + eps)
                * w[None, :, None, None] + b[None, :, None, None])

    # --- Case 1: small shape consistent with the module ---------------------
    N, C, H, W = 2, 4, 16, 16
    max_length = 8
    t = 3
    x = jax.random.normal(k_x, (N, C, H, W), dtype=jnp.float32)
    params = init_params(C, max_length, k_w)

    y, new_rm, new_rv = separated_batch_norm_forward(x, t, params, training=True)
    y = jax.block_until_ready(y)

    xc = x.transpose(1, 0, 2, 3).reshape(C, -1)
    mean_ref = xc.mean(axis=1)
    var_b_ref = xc.var(axis=1)
    y_ref = _bn_ref(x, mean_ref, var_b_ref, params['weight'], params['bias'],
                    params['eps'])
    assert jnp.allclose(y, y_ref, atol=1e-4, rtol=1e-4)

    var_u_ref = xc.var(axis=1, ddof=1)
    rm_ref = (1 - params['momentum']) * params['running_mean'][t] + params['momentum'] * mean_ref
    rv_ref = (1 - params['momentum']) * params['running_var'][t] + params['momentum'] * var_u_ref
    assert jnp.allclose(new_rm[t], rm_ref, atol=1e-4, rtol=1e-4)
    assert jnp.allclose(new_rv[t], rv_ref, atol=1e-4, rtol=1e-4)

    # XLA-fused normalize path (review's top recommendation for in-model use)
    y_xla, _, _ = separated_batch_norm_forward(x, t, params, training=True,
                                               normalize="xla")
    assert jnp.allclose(jax.block_until_ready(y_xla), y_ref, atol=1e-4, rtol=1e-4)

    # bf16-output path (halves write bandwidth of the normalize sweep)
    y_bf, _, _ = separated_batch_norm_forward(x, t, params, training=True,
                                              out_dtype=jnp.bfloat16)
    y_bf = jax.block_until_ready(y_bf)
    assert y_bf.dtype == jnp.bfloat16
    assert jnp.allclose(y_bf.astype(jnp.float32), y_ref, atol=5e-2, rtol=5e-2)

    # eval mode (uses running stats of timestep t)
    y_eval, _, _ = separated_batch_norm_forward(x, t, params, training=False)
    y_eval = jax.block_until_ready(y_eval)
    y_eval_ref = _bn_ref(x, params['running_mean'][t], params['running_var'][t],
                         params['weight'], params['bias'], params['eps'])
    assert jnp.allclose(y_eval, y_eval_ref, atol=1e-4, rtol=1e-4)

    # --- Case 2: ResNet-like HW (14x14 = 196, not a multiple of 128) --------
    # Exercises the lane-aligned cdiv grid + masked tail tile in the stats pass.
    N2, C2, H2, W2 = 2, 8, 14, 14
    x2 = jax.random.normal(k_x2, (N2, C2, H2, W2), dtype=jnp.float32)
    params2 = init_params(C2, max_length, k_w)
    y2, _, _ = separated_batch_norm_forward(x2, 0, params2, training=True)
    y2 = jax.block_until_ready(y2)

    xc2 = x2.transpose(1, 0, 2, 3).reshape(C2, -1)
    y2_ref = _bn_ref(x2, xc2.mean(axis=1), xc2.var(axis=1),
                     params2['weight'], params2['bias'], params2['eps'])
    assert jnp.allclose(y2, y2_ref, atol=1e-4, rtol=1e-4)

    # --- Case 3: force a genuinely multi-tile HW grid ------------------------
    N3, C3, H3, W3 = 2, 8, 32, 32          # HW = 1024
    x3_in = jax.random.normal(k_x3, (N3, C3, H3, W3), dtype=jnp.float32)
    params3 = init_params(C3, max_length, k_w)
    # Budget small enough that tile_hw == 128 -> grid (2, 8)
    y3, _, _ = separated_batch_norm_forward(x3_in, 1, params3, training=True,
                                            max_block_bytes=C3 * 128 * 4)
    y3 = jax.block_until_ready(y3)

    xc3 = x3_in.transpose(1, 0, 2, 3).reshape(C3, -1)
    y3_ref = _bn_ref(x3_in, xc3.mean(axis=1), xc3.var(axis=1),
                     params3['weight'], params3['bias'], params3['eps'])
    assert jnp.allclose(y3, y3_ref, atol=1e-4, rtol=1e-4)

    print("KERNEL_OK")
</pallas_src>

<mosaic_0001>
module attributes {stable_mosaic.version = 11 : i64} {
  func.func @kernel(%arg0: i32, %arg1: i32, %arg2: memref<1x4x256xf32, #tpu.memory_space<vmem>>, %arg3: memref<1x4x1xf32, #tpu.memory_space<vmem>>, %arg4: memref<1x4x1xf32, #tpu.memory_space<vmem>>) attributes {dimension_semantics = [#tpu.dimension_semantics<parallel>, #tpu.dimension_semantics<arbitrary>], iteration_bounds = array<i64: 2, 1>, scalar_prefetch = 0 : i64, scratch_operands = 0 : i64, tpu.core_type = #tpu.core_type<tc>, window_params = [{transform_indices = @transform_0, window_bounds = array<i64: 1, 4, 256>}, {transform_indices = @transform_1, window_bounds = array<i64: 1, 4, 1>}, {transform_indices = @transform_2, window_bounds = array<i64: 1, 4, 1>}]} {
    %c0_i32 = arith.constant 0 : i32
    %0 = arith.cmpi eq, %arg1, %c0_i32 : i32
    %1 = arith.extui %0 : i1 to i32
    %c0_i32_0 = arith.constant 0 : i32
    %2 = arith.cmpi ne, %1, %c0_i32_0 : i32
    scf.if %2 {
      %cst_16 = arith.constant 0.000000e+00 : f32
      %22 = vector.broadcast %cst_16 : f32 to vector<1x4x1xf32>
      %c0_17 = arith.constant 0 : index
      %c0_18 = arith.constant 0 : index
      %c0_19 = arith.constant 0 : index
      %23 = vector.load %arg3[%c0_17, %c0_18, %c0_19] : memref<1x4x1xf32, #tpu.memory_space<vmem>>, vector<1x4x1xf32>
      tpu.vector_store %arg3[%c0_17, %c0_18, %c0_19], %22 {strides = array<i32>} : memref<1x4x1xf32, #tpu.memory_space<vmem>>, vector<1x4x1xf32>,
      %cst_20 = arith.constant 0.000000e+00 : f32
      %24 = vector.broadcast %cst_20 : f32 to vector<1x4x1xf32>
      %c0_21 = arith.constant 0 : index
      %c0_22 = arith.constant 0 : index
      %c0_23 = arith.constant 0 : index
      %25 = vector.load %arg4[%c0_21, %c0_22, %c0_23] : memref<1x4x1xf32, #tpu.memory_space<vmem>>, vector<1x4x1xf32>
      tpu.vector_store %arg4[%c0_21, %c0_22, %c0_23], %24 {strides = array<i32>} : memref<1x4x1xf32, #tpu.memory_space<vmem>>, vector<1x4x1xf32>,
    } else {
    }
    %c0 = arith.constant 0 : index
    %c0_1 = arith.constant 0 : index
    %c0_2 = arith.constant 0 : index
    %3 = vector.load %arg2[%c0, %c0_1, %c0_2] : memref<1x4x256xf32, #tpu.memory_space<vmem>>, vector<1x4x256xf32>
    %4 = vector.shape_cast %3 : vector<1x4x256xf32> to vector<4x256xf32>
    %c0_3 = arith.constant 0 : index
    %c0_4 = arith.constant 0 : index
    %c0_5 = arith.constant 0 : index
    %5 = vector.load %arg3[%c0_3, %c0_4, %c0_5] : memref<1x4x1xf32, #tpu.memory_space<vmem>>, vector<1x4x1xf32>
    %6 = vector.shape_cast %5 : vector<1x4x1xf32> to vector<4x1xf32>
    %cst = arith.constant dense<0.000000e+00> : vector<4xf32>
    %7 = vector.multi_reduction <add>, %4, %cst [1] : vector<4x256xf32> to vector<4xf32>
    %8 = vector.shape_cast %7 : vector<4xf32> to vector<4x1xf32>
    %9 = arith.addf %6, %8 : vector<4x1xf32>
    %c0_6 = arith.constant 0 : index
    %c0_7 = arith.constant 0 : index
    %c0_8 = arith.constant 0 : index
    %10 = vector.load %arg3[%c0_6, %c0_7, %c0_8] : memref<1x4x1xf32, #tpu.memory_space<vmem>>, vector<1x4x1xf32>
    %11 = vector.shape_cast %10 : vector<1x4x1xf32> to vector<4x1xf32>
    %12 = vector.shape_cast %9 : vector<4x1xf32> to vector<1x4x1xf32>
    tpu.vector_store %arg3[%c0_6, %c0_7, %c0_8], %12 {strides = array<i32>} : memref<1x4x1xf32, #tpu.memory_space<vmem>>, vector<1x4x1xf32>,
    %c0_9 = arith.constant 0 : index
    %c0_10 = arith.constant 0 : index
    %c0_11 = arith.constant 0 : index
    %13 = vector.load %arg4[%c0_9, %c0_10, %c0_11] : memref<1x4x1xf32, #tpu.memory_space<vmem>>, vector<1x4x1xf32>
    %14 = vector.shape_cast %13 : vector<1x4x1xf32> to vector<4x1xf32>
    %15 = arith.mulf %4, %4 : vector<4x256xf32>
    %cst_12 = arith.constant dense<0.000000e+00> : vector<4xf32>
    %16 = vector.multi_reduction <add>, %15, %cst_12 [1] : vector<4x256xf32> to vector<4xf32>
    %17 = vector.shape_cast %16 : vector<4xf32> to vector<4x1xf32>
    %18 = arith.addf %14, %17 : vector<4x1xf32>
    %c0_13 = arith.constant 0 : index
    %c0_14 = arith.constant 0 : index
    %c0_15 = arith.constant 0 : index
    %19 = vector.load %arg4[%c0_13, %c0_14, %c0_15] : memref<1x4x1xf32, #tpu.memory_space<vmem>>, vector<1x4x1xf32>
    %20 = vector.shape_cast %19 : vector<1x4x1xf32> to vector<4x1xf32>
    %21 = vector.shape_cast %18 : vector<4x1xf32> to vector<1x4x1xf32>
    tpu.vector_store %arg4[%c0_13, %c0_14, %c0_15], %21 {strides = array<i32>} : memref<1x4x1xf32, #tpu.memory_space<vmem>>, vector<1x4x1xf32>,
    return
  }
  func.func @transform_0(%arg0: i32, %arg1: i32) -> (i32, i32, i32) {
    %c0_i32 = arith.constant 0 : i32
    %c0_i32_0 = arith.constant 0 : i32
    return %arg0, %c0_i32, %arg1 : i32, i32, i32
  }
  func.func @transform_1(%arg0: i32, %arg1: i32) -> (i32, i32, i32) {
    %c0_i32 = arith.constant 0 : i32
    %c0_i32_0 = arith.constant 0 : i32
    %c0_i32_1 = arith.constant 0 : i32
    return %arg0, %c0_i32, %c0_i32_0 : i32, i32, i32
  }
  func.func @transform_2(%arg0: i32, %arg1: i32) -> (i32, i32, i32) {
    %c0_i32 = arith.constant 0 : i32
    %c0_i32_0 = arith.constant 0 : i32
    %c0_i32_1 = arith.constant 0 : i32
    return %arg0, %c0_i32, %c0_i32_0 : i32, i32, i32
  }
}

</mosaic_0001>

<bundles_post_ra>
// kernel: tpu_custom_call.1
= control target key start
LH: loop header
LB: loop body
LE: loop exit
PB: predicated region body
PF: predicated region fallthrough
CT: control target
= control target key end

     0   :  { %8 = vsyncpa [#allocation3], 0  ;;  %s603_s0 = inlined_call_operand.hbm [shape: f32[2,4,256], index: 0, kind: input, shape index: {}]   ;;  %s604_s1 = inlined_call_operand.vmem [shape: f32[2,4,1], index: 1, kind: output, shape index: {0}]   ;;  %s605_s2 = inlined_call_operand.vmem [shape: f32[2,4,1], index: 2, kind: output, shape index: {1}]  }
   0x1   :  { %10 = vsyncpa [#allocation3 + $0x1], 0  ;;  %s496_s9 = smov 0   ;;  %s498_s10 = smov 0  }
   0x2   :  { %s500_s11 = smov 0   ;;  %s502_s12 = smov 0  }
   0x3   :  { %s504_s13 = smov 0   ;;  %s506_s14 = smov 0  }
   0x4 LB: > { %s328_s15 = sadd.s32 4294967295, %s477_s14   ;;  %s28_s16 = sadd.s32 1, %s473_s13  ;;  %s477_s14 = sphi %s506_s14, %s16_s14   ;;  %s473_s13 = sphi %s504_s13, %s613_s13   ;;  %s469_s12 = sphi %s502_s12, %s612_s12   ;;  %s465_s11 = sphi %s500_s11, %s611_s11   ;;  %s461_s10 = sphi %s498_s10, %s610_s10   ;;  %s457_s9 = sphi %s496_s9, %s609_s9  }
   0x5   : > { %p30_p0 = scmp.ge.s32.totalorder %s28_s16, 2  ;;  %s37_s17 = sadd.s32 1, %s465_s11 }
   0x6   : > { %p44_p1 = scmp.ne.s32.totalorder %s465_s11, %s461_s10  ;;  %p45_p2 = scmp.eq.s32.totalorder %s477_s14, 0 }
   0x7   : > { %s615_s16 = smov (%p30_p0, %s28_s16), 0  ;;  %p50_p4 = scmp.ne.s32.totalorder %s461_s10, %s457_s9 }
   0x8   : > { %p532_p3 = por %p45_p2, %p44_p1  ;;  %s32_s19 = ssub.s32 %s473_s13, %s615_s16 }
   0x9   : > { %p51_p5 = scmp.eq.s32.totalorder %s328_s15, 0  ;;  %p35_p6 = scmp.eq.s32.totalorder %s32_s19, 0 }
   0xa   : > { %p348_p8 = scmp.lt.s32.totalorder %s477_s14, 2  ;;  %s126_s22 = sand.u32 1, %s465_s11  }
   0xb   : > { %p539_p7 = por %p51_p5, %p50_p4  ;;  %s341_s23 = sshll.u32 %s473_s13, 7 }
   0xc   : > { %s545_s21 = scalar_select %p35_p6, %s465_s11, %s37_s17  }
   0xd   : > { %s332_s24 = sshll.u32 %s126_s22, 3  ;;  %s138_s27 = scalar_lea.hbm %s603_s0, %s341_s23 }
   0xe   : > { %s130_s28 = scalar_lea.vmem [#allocation2], %s332_s24  ;;  %p554_p9 = pnand %p348_p8, %p532_p3 }
   0xf   : > { %s140_s29 = sshll.u32 %s130_s28, 4  ;;  %p335_p10 = scmp.ge.s32.totalorder %s477_s14, 1  ;;  %s141_s29 = int_to_ptr.vmem [resolvable:$true] %s140_s29 }
  0x10   : > { %p145_p11 = scmp.lt.s32.totalorder %s477_s14, 3  ;;  %s127_s3 = scalar_lea.sflag [#allocation3], %s126_s22 }
  0x11   : > { %p401_p12 = pneg %p554_p9  ;;  %s412_s4 = scalar_lea.vmem %s141_s29, 128 }
  0x12   : > { %p413_p13 = scmp.ne.s32.totalorder %s141_s29, %s412_s4  ;;  %s479_s5 = smov [#allocation2]  }
  0x13   : > { %s417_s6 = sshll.u32 %s479_s5, 4  ;;  %s418_s6 = int_to_ptr.vmem [resolvable:$false] %s417_s6 }
  0x14   : > { %p415_p0 = pnand %p413_p13, %p401_p12  ;;  %s419_s7 = scalar_lea.vmem %s418_s6, 256 }
  0x15   : > { %p420_p2 = scmp.lt.s32.totalorder %s141_s29, %s418_s6  ;;  %p421_p3 = scmp.lt.s32.totalorder %s419_s7, %s412_s4 }
  0x16   : > { %p416_p1 = pneg %p415_p0 }
  0x17   : > { %p422_p4 = por %p421_p3, %p420_p2 }
  0x19   : > { %p423_p5 = pnand %p422_p4, %p416_p1 }
  0x1b   : > { %426 = shalt.err (!%p423_p5)
}
  0x1c   : > { %347 = dma.hbm_to_vmem [thread:$0]  (!%p554_p9), %s138_s27, 128, %s141_s29, %s127_s3  }
  0x1d   : > { %p146_p6 = pnand %p335_p10, %p145_p11 }
  0x1e   : > { %s151_s8 = sand.u32 (!%p146_p6), 1, %s461_s10  }
  0x1f   : > { %149 = sbr.rel (%p146_p6) target bundleno = 188 (0xbc), region = 24  ;;  %s336_s9 = sshll.u32 (!%p146_p6), %s151_s8, 3 }
  0x20   : > { %s152_s15 = scalar_lea.sflag (!%p146_p6), [#allocation3], %s151_s8  ;;  %s155_s17 = scalar_lea.vmem (!%p146_p6), [#allocation2], %s336_s9 }
  0x24   : > { %452 = dma.done.wait (%p539_p7), %s152_s15, 128  }
  0x25   : > { %454 = vsyncadd (%p539_p7), %s152_s15, 4294967168  ;;  %p180_p8 = scmp.lt.s32.totalorder %s469_s12, 1  ;;  %vm192_vm0 = vcmask 3072   ;;  %vm200_vm1 = vcmask 1043456   ;;  %v480_v0 = vmov 0.0   ;;  %v195_v1 = vld [vmem:[%s155_s17] sm:$0xff] }
  0x26   : > { %v198_v2 = vcombine.high %v195_v1, %v195_v1  ;;  %v201_v3 = vsel %vm200_vm1, %v195_v1, 0.0  ;;  %v210_v4 = vmul.f32 %v195_v1, %v195_v1 }
  0x27   : > { %s617_s12 = smov (!%p180_p8, %s469_s12), 1 }
  0x28   : > { %s337_s18 = sshll.u32 %s617_s12, 2  ;;  %v202_v5 = vsel %vm200_vm1, %v198_v2, 0.0  ;;  %v212_v6 = vcombine.high %v210_v4, %v210_v4  ;;  %v214_v7 = vsel %vm200_vm1, %v210_v4, 0.0 }
  0x29   : > { %s183_s23 = scalar_lea.vmem %s604_s1, %s337_s18  ;;  %v203_v8 = vadd.f32 %v202_v5, %v201_v3  ;;  %s187_s24 = scalar_lea.vmem %s605_s2, %s337_s18 }
  0x2a   : > { %193 = vst.msk [vmem:[%s183_s23] sm:$0xf] %vm192_vm0, %v480_v0  ;;  %v215_v9 = vsel %vm200_vm1, %v212_v6, 0.0  ;;  %194 = vst.msk [vmem:[%s187_s24] sm:$0xf] %vm192_vm0, %v480_v0 }
  0x2b   : > { %204 = vadd.xlane.f32.xlu0 %v203_v8  ;;  %v216_v10 = vadd.f32 %v215_v9, %v214_v7 }
  0x2f   : > { %217 = vadd.xlane.f32.xlu0 %v216_v10 }
  0x31   : > { %v196_v11 = vld [vmem:[%s183_s23] sm:$0xf] }
  0x32   : > { %v209_v14 = vld [vmem:[%s187_s24] sm:$0xf] }
  0xb4   : > { %v205_v12 = vpop.xlane.xlu0 %204 }
  0xb5   : > { %v206_v13 = vadd.f32 %v205_v12, %v196_v11 }
  0xb7   : > { %208 = vst.msk [vmem:[%s183_s23] sm:$0xf] %vm192_vm0, %v206_v13 }
  0xb8   : > { %v218_v15 = vpop.xlane.xlu0 %217 }
  0xb9   : > { %v219_v16 = vadd.f32 %v218_v15, %v209_v14 }
  0xbb   : > { %220 = vst.msk [vmem:[%s187_s24] sm:$0xf] %vm192_vm0, %v219_v16 }
  0xbc PF: > { %s16_s14 = sadd.s32 1, %s477_s14   ;;  %s609_s9 = smov %s461_s10 }
  0xbd   : > { %p13_p7 = scmp.ge.s32.totalorder %s16_s14, 4   ;;  %s610_s10 = smov %s465_s11 }
  0xbe   : > { %s611_s11 = smov %s545_s21  ;;  %s612_s12 = smov %s473_s13 }
  0xbf   : > { %s613_s13 = smov %s615_s16  ;;  %15 = sbr.rel (!%p13_p7) target bundleno = 4 (0x4), region = 80 }
  0xc4   :  { %254 = vsyncpa [#allocation3], 1 }
  0xc5   :  { %256 = vsyncpa [#allocation3 + $0x1], 1 }

</bundles_post_ra>
